<compile_context>
chip_gen: v7x
topology: tpu7x:2x2x1
jax: 0.10.0
libtpu: 0.0.40
codegen_flags: <defaults>
</compile_context>

<pallas_src>
import functools

import jax
import jax.numpy as jnp
from jax.experimental import pallas as pl
from jax.experimental.pallas import tpu as pltpu


_LANE = 128      # lane width (last-dim alignment)
_SUBLANE = 16    # sublane alignment (covers bf16 packing)


def _round_up(x, m):
    return (x + m - 1) // m * m


def _epilogue_dtype():
    """bf16 elementwise epilogue on chips with a bf16 VPU/EUP (v6e / v7x)."""
    try:
        kind = jax.devices()[0].device_kind.lower()
    except Exception:  # pragma: no cover - defensive
        return jnp.float32
    return jnp.bfloat16 if ("v6" in kind or "v7" in kind) else jnp.float32


# -----------------------------------------------------------------------------
# Fused kernel: encoder -> reparameterization -> decoder
# -----------------------------------------------------------------------------
def _vae_kernel(x_ref, eps_ref,
                ew1_ref, eb1_ref, ewml_ref, ebml_ref,
                dw1_ref, db1_ref, dw2_ref, db2_ref,
                mu_ref, logvar_ref, xhat_ref, *, epi_dtype):
    cdt = ew1_ref.dtype          # MXU feed dtype (bf16); accumulation is f32.
    lp = mu_ref.shape[-1]        # padded latent width (lane-aligned)

    # ---- Encoder hidden: relu(x W1 + b1) ----
    h = jnp.dot(x_ref[...], ew1_ref[...], preferred_element_type=jnp.float32)
    h = (h + eb1_ref[...]).astype(epi_dtype)
    h = jnp.maximum(h, 0.0).astype(cdt)

    # ---- Fused mu|log_var projection: one 2*l_pad-wide MXU pass ----
    ml = jnp.dot(h, ewml_ref[...],
                 preferred_element_type=jnp.float32) + ebml_ref[...]
    mu = ml[:, :lp]              # lane-aligned slices (lp is a multiple of 128)
    log_var = ml[:, lp:]
    mu_ref[...] = mu
    logvar_ref[...] = log_var

    # ---- Reparameterization (f32): z = mu + eps * exp(0.5 * log_var) ----
    z = mu + eps_ref[...] * jnp.exp(0.5 * log_var)

    # ---- Decoder: relu(z Wd1 + bd1) -> sigmoid(. Wd2 + bd2) ----
    hd = jnp.dot(z.astype(cdt), dw1_ref[...],
                 preferred_element_type=jnp.float32)
    hd = (hd + db1_ref[...]).astype(epi_dtype)
    hd = jnp.maximum(hd, 0.0).astype(cdt)
    logits = jnp.dot(hd, dw2_ref[...],
                     preferred_element_type=jnp.float32) + db2_ref[...]
    # sigmoid(x) == 0.5 * tanh(0.5 * x) + 0.5 : a single EUP tanh, no divide.
    s = logits.astype(epi_dtype)
    xhat_ref[...] = (0.5 * jnp.tanh(0.5 * s) + 0.5).astype(xhat_ref.dtype)


# -----------------------------------------------------------------------------
# Parameters (deterministic init, pre-padded to TPU-friendly shapes)
# -----------------------------------------------------------------------------
def init_vae_params(key, in_features, hidden, latent,
                    compute_dtype=jnp.bfloat16):
    """Weights stored pre-padded (feature axes -> multiples of 128) and cast to
    `compute_dtype` for the MXU.  Biases stay float32.  The mu / log_var
    projections are stored fused as one (hidden, 2*l_pad) weight."""
    assert hidden % _LANE == 0, "hidden width must be a multiple of 128"
    d_pad = _round_up(in_features, _LANE)
    l_pad = _round_up(latent, _LANE)
    ks = jax.random.split(key, 5)

    def dense(k, fan_in, fan_out, pad_in, pad_out):
        scale = 1.0 / jnp.sqrt(jnp.float32(fan_in))
        w = jax.random.uniform(k, (fan_in, fan_out), jnp.float32, -scale, scale)
        w = jnp.pad(w, ((0, pad_in - fan_in), (0, pad_out - fan_out)))
        b = jnp.zeros((1, pad_out), jnp.float32)
        return w.astype(compute_dtype), b

    enc_w1, enc_b1 = dense(ks[0], in_features, hidden, d_pad, hidden)
    enc_wmu, enc_bmu = dense(ks[1], hidden, latent, hidden, l_pad)
    enc_wlv, enc_blv = dense(ks[2], hidden, latent, hidden, l_pad)
    # Fused [mu | log_var] projection weight / bias.
    enc_wml = jnp.concatenate([enc_wmu, enc_wlv], axis=1)
    enc_bml = jnp.concatenate([enc_bmu, enc_blv], axis=1)
    dec_w1, dec_b1 = dense(ks[3], latent, hidden, l_pad, hidden)
    dec_w2, dec_b2 = dense(ks[4], hidden, in_features, hidden, d_pad)
    return dict(enc_w1=enc_w1, enc_b1=enc_b1,
                enc_wml=enc_wml, enc_bml=enc_bml,
                dec_w1=dec_w1, dec_b1=dec_b1,
                dec_w2=dec_w2, dec_b2=dec_b2)


# -----------------------------------------------------------------------------
# Wrapper
# -----------------------------------------------------------------------------
@functools.partial(jax.jit, static_argnames=("latent",))
def vae_forward(x_nchw, params, eps, latent):
    n, c, h, w = x_nchw.shape
    d = c * h * w
    d_pad, hidden = params["enc_w1"].shape
    l_pad = params["enc_wml"].shape[1] // 2
    compute_dtype = params["enc_w1"].dtype
    epi_dtype = _epilogue_dtype()

    # Batch tile: ensure >= 2 grid steps when the batch allows it (so the
    # "parallel" batch axis can shard across v7x's two TensorCores); go to
    # 256-row tiles for very large batches (amortizes ~0.35us/step overhead).
    if n >= 512:
        tm = 256
    elif n >= 2 * _SUBLANE:
        tm = min(128, _round_up((n + 1) // 2, _SUBLANE))
    else:
        tm = _round_up(n, _SUBLANE)
    n_pad = _round_up(n, tm)

    x2 = x_nchw.reshape(n, d).astype(compute_dtype)
    eps2 = eps.astype(jnp.float32)
    # Pad only when actually required (each pad is an extra HBM copy).
    if n_pad != n or d_pad != d:
        x2 = jnp.pad(x2, ((0, n_pad - n), (0, d_pad - d)))
    if n_pad != n or l_pad != latent:
        eps2 = jnp.pad(eps2, ((0, n_pad - n), (0, l_pad - latent)))

    def act_spec(width):
        return pl.BlockSpec((tm, width), lambda i: (i, 0))

    def resident_spec(arr):
        # Grid-invariant whole-array block: fetched once, reused every step.
        return pl.BlockSpec(arr.shape, lambda i: (0, 0))

    # Scoped-VMEM budget sized from the real working set (double-buffered
    # activations / outputs / weights) with ~50% headroom for internal scratch.
    weight_bytes = sum(int(v.size) * v.dtype.itemsize for v in params.values())
    act_bytes = tm * d_pad * 2 + tm * l_pad * 4            # x (bf16) + eps (f32)
    out_bytes = 2 * tm * l_pad * 4 + tm * d_pad * 2        # mu, logvar (f32) + xhat (bf16)
    vmem_limit = int(1.5 * 2 * (weight_bytes + act_bytes + out_bytes)) + (2 << 20)
    vmem_limit = max(min(vmem_limit, 64 << 20), 32 << 20)  # valid on v5e/v6e/v7x

    mu_p, logvar_p, xhat_p = pl.pallas_call(
        functools.partial(_vae_kernel, epi_dtype=epi_dtype),
        out_shape=(jax.ShapeDtypeStruct((n_pad, l_pad), jnp.float32),
                   jax.ShapeDtypeStruct((n_pad, l_pad), jnp.float32),
                   jax.ShapeDtypeStruct((n_pad, d_pad), compute_dtype)),
        grid=(n_pad // tm,),
        in_specs=[
            act_spec(d_pad),                      # x
            act_spec(l_pad),                      # eps
            resident_spec(params["enc_w1"]), resident_spec(params["enc_b1"]),
            resident_spec(params["enc_wml"]), resident_spec(params["enc_bml"]),
            resident_spec(params["dec_w1"]), resident_spec(params["dec_b1"]),
            resident_spec(params["dec_w2"]), resident_spec(params["dec_b2"]),
        ],
        out_specs=(act_spec(l_pad), act_spec(l_pad), act_spec(d_pad)),
        compiler_params=pltpu.CompilerParams(
            dimension_semantics=("parallel",),
            vmem_limit_bytes=vmem_limit),
    )(x2, eps2,
      params["enc_w1"], params["enc_b1"],
      params["enc_wml"], params["enc_bml"],
      params["dec_w1"], params["db1"] if "db1" in params else params["dec_b1"],
      params["dec_w2"], params["dec_b2"])

    mu = mu_p if (n_pad == n and l_pad == latent) else mu_p[:n, :latent]
    log_var = logvar_p if (n_pad == n and l_pad == latent) else logvar_p[:n, :latent]
    xh = xhat_p if (n_pad == n and d_pad == d) else xhat_p[:n, :d]
    x_hat = xh.astype(x_nchw.dtype).reshape(n, c, h, w)
    return (mu, log_var), x_hat


# -----------------------------------------------------------------------------
# Main
# -----------------------------------------------------------------------------
if __name__ == "__main__":
    LATENT = 64     # latent_space_size default from the PyTorch module
    HIDDEN = 128
    N, C, H, W = 2, 1, 16, 16
    D = C * H * W

    key = jax.random.PRNGKey(0)
    k_x, k_eps, k_params = jax.random.split(key, 3)

    x = jax.random.uniform(k_x, (N, C, H, W), jnp.float32)          # NCHW input
    eps = jax.random.normal(k_eps, (N, LATENT), jnp.float32)        # ~ randn_like(std)
    params = init_vae_params(k_params, D, HIDDEN, LATENT)

    (mu, log_var), x_hat = vae_forward(x, params, eps, latent=LATENT)
    jax.block_until_ready((mu, log_var, x_hat))

    # ---- Pure-JAX reference (same bf16-rounded weights / casts) ----
    def ref_forward(x_img, eps_l):
        cd = params["enc_w1"].dtype
        epi = _epilogue_dtype()
        Wf = {k: v.astype(jnp.float32) for k, v in params.items()}
        d_pad_ = params["enc_w1"].shape[0]
        l_pad_ = params["enc_wml"].shape[1] // 2
        xf = x_img.reshape(N, D).astype(cd).astype(jnp.float32)
        xf = jnp.pad(xf, ((0, 0), (0, d_pad_ - D)))
        h1 = (xf @ Wf["enc_w1"] + Wf["enc_b1"]).astype(epi).astype(jnp.float32)
        h1 = jnp.maximum(h1, 0.0).astype(cd).astype(jnp.float32)
        ml = h1 @ Wf["enc_wml"] + Wf["enc_bml"]
        mu_r, lv_r = ml[:, :l_pad_], ml[:, l_pad_:]
        eps_pad = jnp.pad(eps_l, ((0, 0), (0, l_pad_ - LATENT)))
        z = (mu_r + eps_pad * jnp.exp(0.5 * lv_r)).astype(cd).astype(jnp.float32)
        h2 = (z @ Wf["dec_w1"] + Wf["dec_b1"]).astype(epi).astype(jnp.float32)
        h2 = jnp.maximum(h2, 0.0).astype(cd).astype(jnp.float32)
        xh = jax.nn.sigmoid(h2 @ Wf["dec_w2"] + Wf["dec_b2"])
        return (mu_r[:, :LATENT], lv_r[:, :LATENT],
                xh[:, :D].reshape(N, C, H, W))

    mu_r, lv_r, xh_r = ref_forward(x, eps)

    assert mu.shape == (N, LATENT)
    assert log_var.shape == (N, LATENT)
    assert x_hat.shape == (N, C, H, W)
    assert bool(jnp.all(jnp.isfinite(mu)))
    assert bool(jnp.all(jnp.isfinite(log_var)))
    assert bool(jnp.all((x_hat >= 0.0) & (x_hat <= 1.0)))
    assert bool(jnp.allclose(mu, mu_r, atol=2e-2, rtol=2e-2))
    assert bool(jnp.allclose(log_var, lv_r, atol=2e-2, rtol=2e-2))
    assert bool(jnp.allclose(x_hat, xh_r, atol=2e-2, rtol=2e-2))

    print("KERNEL_OK")
</pallas_src>

<mosaic_0001>
module attributes {stable_mosaic.version = 11 : i64} {
  func.func @_vae_kernel(%arg0: i32, %arg1: memref<16x256xbf16, #tpu.memory_space<vmem>>, %arg2: memref<16x128xf32, #tpu.memory_space<vmem>>, %arg3: memref<256x128xbf16, #tpu.memory_space<vmem>>, %arg4: memref<1x128xf32, #tpu.memory_space<vmem>>, %arg5: memref<128x256xbf16, #tpu.memory_space<vmem>>, %arg6: memref<1x256xf32, #tpu.memory_space<vmem>>, %arg7: memref<128x128xbf16, #tpu.memory_space<vmem>>, %arg8: memref<1x128xf32, #tpu.memory_space<vmem>>, %arg9: memref<128x256xbf16, #tpu.memory_space<vmem>>, %arg10: memref<1x256xf32, #tpu.memory_space<vmem>>, %arg11: memref<16x128xf32, #tpu.memory_space<vmem>>, %arg12: memref<16x128xf32, #tpu.memory_space<vmem>>, %arg13: memref<16x256xbf16, #tpu.memory_space<vmem>>) attributes {dimension_semantics = [#tpu.dimension_semantics<parallel>], iteration_bounds = array<i64: 1>, scalar_prefetch = 0 : i64, scratch_operands = 0 : i64, tpu.core_type = #tpu.core_type<tc>, window_params = [{transform_indices = @transform_0, window_bounds = array<i64: 16, 256>}, {transform_indices = @transform_1, window_bounds = array<i64: 16, 128>}, {pipeline_mode = #tpu.pipeline_mode<synchronous>, transform_indices = @transform_2, window_bounds = array<i64: 256, 128>}, {pipeline_mode = #tpu.pipeline_mode<synchronous>, transform_indices = @transform_3, window_bounds = array<i64: 1, 128>}, {pipeline_mode = #tpu.pipeline_mode<synchronous>, transform_indices = @transform_4, window_bounds = array<i64: 128, 256>}, {pipeline_mode = #tpu.pipeline_mode<synchronous>, transform_indices = @transform_5, window_bounds = array<i64: 1, 256>}, {pipeline_mode = #tpu.pipeline_mode<synchronous>, transform_indices = @transform_6, window_bounds = array<i64: 128, 128>}, {pipeline_mode = #tpu.pipeline_mode<synchronous>, transform_indices = @transform_7, window_bounds = array<i64: 1, 128>}, {pipeline_mode = #tpu.pipeline_mode<synchronous>, transform_indices = @transform_8, window_bounds = array<i64: 128, 256>}, {pipeline_mode = #tpu.pipeline_mode<synchronous>, transform_indices = @transform_9, window_bounds = array<i64: 1, 256>}, {transform_indices = @transform_10, window_bounds = array<i64: 16, 128>}, {transform_indices = @transform_11, window_bounds = array<i64: 16, 128>}, {transform_indices = @transform_12, window_bounds = array<i64: 16, 256>}]} {
    %c0 = arith.constant 0 : index
    %c0_0 = arith.constant 0 : index
    %0 = vector.load %arg1[%c0, %c0_0] : memref<16x256xbf16, #tpu.memory_space<vmem>>, vector<16x256xbf16>
    %c0_1 = arith.constant 0 : index
    %c0_2 = arith.constant 0 : index
    %1 = vector.load %arg3[%c0_1, %c0_2] : memref<256x128xbf16, #tpu.memory_space<vmem>>, vector<256x128xbf16>
    %cst = arith.constant dense<0.000000e+00> : vector<16x128xf32>
    %2 = tpu.matmul %0, %1, %cst {dimension_numbers = #tpu.dot_dimension_numbers<[1], [0], [0], [1], [0, 0, 1, 1], [], []>} : vector<16x256xbf16>, vector<256x128xbf16>, vector<16x128xf32> -> vector<16x128xf32>
    %c0_3 = arith.constant 0 : index
    %c0_4 = arith.constant 0 : index
    %3 = vector.load %arg4[%c0_3, %c0_4] : memref<1x128xf32, #tpu.memory_space<vmem>>, vector<1x128xf32>
    %4 = vector.broadcast %3 : vector<1x128xf32> to vector<16x128xf32>
    %5 = arith.addf %2, %4 : vector<16x128xf32>
    %cst_5 = arith.constant 0.000000e+00 : f32
    %6 = vector.broadcast %cst_5 : f32 to vector<16x128xf32>
    %7 = arith.maximumf %5, %6 : vector<16x128xf32>
    %8 = arith.truncf %7 : vector<16x128xf32> to vector<16x128xbf16>
    %c0_6 = arith.constant 0 : index
    %c0_7 = arith.constant 0 : index
    %9 = vector.load %arg5[%c0_6, %c0_7] : memref<128x256xbf16, #tpu.memory_space<vmem>>, vector<128x256xbf16>
    %cst_8 = arith.constant dense<0.000000e+00> : vector<16x256xf32>
    %10 = tpu.matmul %8, %9, %cst_8 {dimension_numbers = #tpu.dot_dimension_numbers<[1], [0], [0], [1], [0, 0, 1, 1], [], []>} : vector<16x128xbf16>, vector<128x256xbf16>, vector<16x256xf32> -> vector<16x256xf32>
    %c0_9 = arith.constant 0 : index
    %c0_10 = arith.constant 0 : index
    %11 = vector.load %arg6[%c0_9, %c0_10] : memref<1x256xf32, #tpu.memory_space<vmem>>, vector<1x256xf32>
    %12 = vector.broadcast %11 : vector<1x256xf32> to vector<16x256xf32>
    %13 = arith.addf %10, %12 : vector<16x256xf32>
    %14 = vector.extract_strided_slice %13 {offsets = [0, 0], sizes = [16, 128], strides = [1, 1]} : vector<16x256xf32> to vector<16x128xf32>
    %15 = vector.extract_strided_slice %13 {offsets = [0, 128], sizes = [16, 128], strides = [1, 1]} : vector<16x256xf32> to vector<16x128xf32>
    %c0_11 = arith.constant 0 : index
    %c0_12 = arith.constant 0 : index
    %16 = vector.load %arg11[%c0_11, %c0_12] : memref<16x128xf32, #tpu.memory_space<vmem>>, vector<16x128xf32>
    tpu.vector_store %arg11[%c0_11, %c0_12], %14 {strides = array<i32>} : memref<16x128xf32, #tpu.memory_space<vmem>>, vector<16x128xf32>,
    %c0_13 = arith.constant 0 : index
    %c0_14 = arith.constant 0 : index
    %17 = vector.load %arg12[%c0_13, %c0_14] : memref<16x128xf32, #tpu.memory_space<vmem>>, vector<16x128xf32>
    tpu.vector_store %arg12[%c0_13, %c0_14], %15 {strides = array<i32>} : memref<16x128xf32, #tpu.memory_space<vmem>>, vector<16x128xf32>,
    %c0_15 = arith.constant 0 : index
    %c0_16 = arith.constant 0 : index
    %18 = vector.load %arg2[%c0_15, %c0_16] : memref<16x128xf32, #tpu.memory_space<vmem>>, vector<16x128xf32>
    %cst_17 = arith.constant 5.000000e-01 : f32
    %19 = vector.broadcast %cst_17 : f32 to vector<16x128xf32>
    %20 = arith.mulf %19, %15 : vector<16x128xf32>
    %21 = math.exp %20 : vector<16x128xf32>
    %22 = arith.mulf %18, %21 : vector<16x128xf32>
    %23 = arith.addf %14, %22 : vector<16x128xf32>
    %24 = arith.truncf %23 : vector<16x128xf32> to vector<16x128xbf16>
    %c0_18 = arith.constant 0 : index
    %c0_19 = arith.constant 0 : index
    %25 = vector.load %arg7[%c0_18, %c0_19] : memref<128x128xbf16, #tpu.memory_space<vmem>>, vector<128x128xbf16>
    %cst_20 = arith.constant dense<0.000000e+00> : vector<16x128xf32>
    %26 = tpu.matmul %24, %25, %cst_20 {dimension_numbers = #tpu.dot_dimension_numbers<[1], [0], [0], [1], [0, 0, 1, 1], [], []>} : vector<16x128xbf16>, vector<128x128xbf16>, vector<16x128xf32> -> vector<16x128xf32>
    %c0_21 = arith.constant 0 : index
    %c0_22 = arith.constant 0 : index
    %27 = vector.load %arg8[%c0_21, %c0_22] : memref<1x128xf32, #tpu.memory_space<vmem>>, vector<1x128xf32>
    %28 = vector.broadcast %27 : vector<1x128xf32> to vector<16x128xf32>
    %29 = arith.addf %26, %28 : vector<16x128xf32>
    %cst_23 = arith.constant 0.000000e+00 : f32
    %30 = vector.broadcast %cst_23 : f32 to vector<16x128xf32>
    %31 = arith.maximumf %29, %30 : vector<16x128xf32>
    %32 = arith.truncf %31 : vector<16x128xf32> to vector<16x128xbf16>
    %c0_24 = arith.constant 0 : index
    %c0_25 = arith.constant 0 : index
    %33 = vector.load %arg9[%c0_24, %c0_25] : memref<128x256xbf16, #tpu.memory_space<vmem>>, vector<128x256xbf16>
    %cst_26 = arith.constant dense<0.000000e+00> : vector<16x256xf32>
    %34 = tpu.matmul %32, %33, %cst_26 {dimension_numbers = #tpu.dot_dimension_numbers<[1], [0], [0], [1], [0, 0, 1, 1], [], []>} : vector<16x128xbf16>, vector<128x256xbf16>, vector<16x256xf32> -> vector<16x256xf32>
    %c0_27 = arith.constant 0 : index
    %c0_28 = arith.constant 0 : index
    %35 = vector.load %arg10[%c0_27, %c0_28] : memref<1x256xf32, #tpu.memory_space<vmem>>, vector<1x256xf32>
    %36 = vector.broadcast %35 : vector<1x256xf32> to vector<16x256xf32>
    %37 = arith.addf %34, %36 : vector<16x256xf32>
    %cst_29 = arith.constant 5.000000e-01 : f32
    %38 = vector.broadcast %cst_29 : f32 to vector<16x256xf32>
    %39 = arith.mulf %38, %37 : vector<16x256xf32>
    %40 = math.tanh %39 : vector<16x256xf32>
    %cst_30 = arith.constant 5.000000e-01 : f32
    %41 = vector.broadcast %cst_30 : f32 to vector<16x256xf32>
    %42 = arith.mulf %41, %40 : vector<16x256xf32>
    %cst_31 = arith.constant 5.000000e-01 : f32
    %43 = vector.broadcast %cst_31 : f32 to vector<16x256xf32>
    %44 = arith.addf %42, %43 : vector<16x256xf32>
    %45 = arith.truncf %44 : vector<16x256xf32> to vector<16x256xbf16>
    %c0_32 = arith.constant 0 : index
    %c0_33 = arith.constant 0 : index
    %46 = vector.load %arg13[%c0_32, %c0_33] : memref<16x256xbf16, #tpu.memory_space<vmem>>, vector<16x256xbf16>
    tpu.vector_store %arg13[%c0_32, %c0_33], %45 {strides = array<i32>} : memref<16x256xbf16, #tpu.memory_space<vmem>>, vector<16x256xbf16>,
    return
  }
  func.func @transform_0(%arg0: i32) -> (i32, i32) {
    %c0_i32 = arith.constant 0 : i32
    %c0_i32_0 = arith.constant 0 : i32
    return %arg0, %c0_i32 : i32, i32
  }
  func.func @transform_1(%arg0: i32) -> (i32, i32) {
    %c0_i32 = arith.constant 0 : i32
    %c0_i32_0 = arith.constant 0 : i32
    return %arg0, %c0_i32 : i32, i32
  }
  func.func @transform_2(%arg0: i32) -> (i32, i32) {
    %c0_i32 = arith.constant 0 : i32
    %c0_i32_0 = arith.constant 0 : i32
    %c0_i32_1 = arith.constant 0 : i32
    return %c0_i32, %c0_i32_0 : i32, i32
  }
  func.func @transform_3(%arg0: i32) -> (i32, i32) {
    %c0_i32 = arith.constant 0 : i32
    %c0_i32_0 = arith.constant 0 : i32
    %c0_i32_1 = arith.constant 0 : i32
    return %c0_i32, %c0_i32_0 : i32, i32
  }
  func.func @transform_4(%arg0: i32) -> (i32, i32) {
    %c0_i32 = arith.constant 0 : i32
    %c0_i32_0 = arith.constant 0 : i32
    %c0_i32_1 = arith.constant 0 : i32
    return %c0_i32, %c0_i32_0 : i32, i32
  }
  func.func @transform_5(%arg0: i32) -> (i32, i32) {
    %c0_i32 = arith.constant 0 : i32
    %c0_i32_0 = arith.constant 0 : i32
    %c0_i32_1 = arith.constant 0 : i32
    return %c0_i32, %c0_i32_0 : i32, i32
  }
  func.func @transform_6(%arg0: i32) -> (i32, i32) {
    %c0_i32 = arith.constant 0 : i32
    %c0_i32_0 = arith.constant 0 : i32
    %c0_i32_1 = arith.constant 0 : i32
    return %c0_i32, %c0_i32_0 : i32, i32
  }
  func.func @transform_7(%arg0: i32) -> (i32, i32) {
    %c0_i32 = arith.constant 0 : i32
    %c0_i32_0 = arith.constant 0 : i32
    %c0_i32_1 = arith.constant 0 : i32
    return %c0_i32, %c0_i32_0 : i32, i32
  }
  func.func @transform_8(%arg0: i32) -> (i32, i32) {
    %c0_i32 = arith.constant 0 : i32
    %c0_i32_0 = arith.constant 0 : i32
    %c0_i32_1 = arith.constant 0 : i32
    return %c0_i32, %c0_i32_0 : i32, i32
  }
  func.func @transform_9(%arg0: i32) -> (i32, i32) {
    %c0_i32 = arith.constant 0 : i32
    %c0_i32_0 = arith.constant 0 : i32
    %c0_i32_1 = arith.constant 0 : i32
    return %c0_i32, %c0_i32_0 : i32, i32
  }
  func.func @transform_10(%arg0: i32) -> (i32, i32) {
    %c0_i32 = arith.constant 0 : i32
    %c0_i32_0 = arith.constant 0 : i32
    return %arg0, %c0_i32 : i32, i32
  }
  func.func @transform_11(%arg0: i32) -> (i32, i32) {
    %c0_i32 = arith.constant 0 : i32
    %c0_i32_0 = arith.constant 0 : i32
    return %arg0, %c0_i32 : i32, i32
  }
  func.func @transform_12(%arg0: i32) -> (i32, i32) {
    %c0_i32 = arith.constant 0 : i32
    %c0_i32_0 = arith.constant 0 : i32
    return %arg0, %c0_i32 : i32, i32
  }
}

</mosaic_0001>

<bundles_post_ra>
// kernel: vae_forward.1
= control target key start
LH: loop header
LB: loop body
LE: loop exit
PB: predicated region body
PF: predicated region fallthrough
CT: control target
= control target key end

     0   :  { %18 = vsyncpa [#allocation3], 0  ;;  %s1378_s0 = inlined_call_operand.vmem [shape: bf16[16,256], index: 0, kind: input, shape index: {}]   ;;  %s1379_s1 = inlined_call_operand.vmem [shape: f32[16,128], index: 1, kind: input, shape index: {}]   ;;  %s1380_s2 = inlined_call_operand.vmem [shape: bf16[256,128], index: 2, kind: input, shape index: {}]   ;;  %s1381_s3 = inlined_call_operand.hbm [shape: f32[1,128], index: 3, kind: input, shape index: {}]   ;;  %s1382_s4 = inlined_call_operand.hbm [shape: bf16[128,256], index: 4, kind: input, shape index: {}]   ;;  %s1383_s5 = inlined_call_operand.vmem [shape: f32[1,256], index: 5, kind: input, shape index: {}]   ;;  %s1384_s6 = inlined_call_operand.hbm [shape: bf16[128,128], index: 6, kind: input, shape index: {}]   ;;  %s1385_s7 = inlined_call_operand.hbm [shape: f32[1,128], index: 7, kind: input, shape index: {}]   ;;  %s1386_s8 = inlined_call_operand.hbm [shape: bf16[128,256], index: 8, kind: input, shape index: {}]   ;;  %s1387_s9 = inlined_call_operand.hbm [shape: f32[1,256], index: 9, kind: input, shape index: {}]   ;;  %s1388_s10 = inlined_call_operand.vmem [shape: f32[16,128], index: 10, kind: output, shape index: {0}]   ;;  %s1389_s11 = inlined_call_operand.vmem [shape: f32[16,128], index: 11, kind: output, shape index: {1}]   ;;  %s1390_s12 = inlined_call_operand.vmem [shape: bf16[16,256], index: 12, kind: output, shape index: {2}]  }
   0x1   :  { %19 = vsyncpa [#allocation5], 0 }
   0x2   :  { %20 = vsyncpa [#allocation8], 0 }
   0x3   :  { %21 = vsyncpa [#allocation11], 0  ;;  %s1141_s21 = smov [#allocation4]   ;;  %s1001_s25 = scalar_lea.hbm %s1382_s4, 2048 }
   0x4   :  { %s43_s22 = sshll.u32 %s1141_s21, 4  ;;  %p1002_p0 = scmp.ne.s32.totalorder %s1382_s4, %s1001_s25  ;;  %s44_s22 = int_to_ptr.vmem [resolvable:$true] %s43_s22 }
   0x5   :  { %p1005_p1 = scmp.lt.u32.totalorder %s1001_s25, %s1382_s4 }
   0x7   :  { %p1007_p2 = pnand %p1005_p1, %p1002_p0 }
   0x9   :  { %1010 = shalt.err (!%p1007_p2)
}
   0xa   :  { %s1011_s30 = scalar_lea.vmem %s44_s22, 2048  ;;  %p1016_p4 = scmp.lt.s32.totalorder %s44_s22, %s44_s22 }
   0xb   :  { %p1012_p3 = scmp.ne.s32.totalorder %s44_s22, %s1011_s30  ;;  %p1017_p5 = scmp.lt.s32.totalorder %s1011_s30, %s1011_s30 }
   0xd   :  { %p1018_p6 = por %p1017_p5, %p1016_p4 }
   0xf   :  { %p1019_p7 = pnand %p1018_p6, %p1012_p3 }
  0x11   :  { %1022 = shalt.err (!%p1019_p7)
}
  0x12   :  { %s1142_s13 = smov 128   ;;  %s1143_s14 = smov 8  }
  0x13   :  { %49 = dma.hbm_to_vmem [thread:$0]  %s1382_s4, 2048, %s44_s22, [#allocation5], %s1142_s13, %s1142_s13, %s1143_s14  }
  0x14   :  { %s1144_s17 = smov [#allocation7]   ;;  %s1145_s19 = smov [#allocation2]  }
  0x15   :  { %s70_s18 = sshll.u32 %s1144_s17, 4  ;;  %s34_s20 = sshll.u32 %s1145_s19, 4  ;;  %s71_s18 = int_to_ptr.vmem [resolvable:$true] %s70_s18  ;;  %s35_s20 = int_to_ptr.vmem [resolvable:$true] %s34_s20 }
  0x16   :  { %s1023_s24 = scalar_lea.hbm %s1385_s7, 16 }
  0x17   :  { %p1024_p8 = scmp.ne.s32.totalorder %s1385_s7, %s1023_s24  ;;  %p1027_p9 = scmp.lt.u32.totalorder %s1023_s24, %s1385_s7 }
  0x19   :  { %p1029_p10 = pnand %p1027_p9, %p1024_p8 }
  0x1b   :  { %1032 = shalt.err (!%p1029_p10)
}
  0x1c   :  { %s1033_s4 = scalar_lea.vmem %s71_s18, 16  ;;  %s1037_s22 = scalar_lea.vmem %s71_s18, 32 }
  0x1d   :  { %p1034_p11 = scmp.ne.s32.totalorder %s71_s18, %s1033_s4  ;;  %p1038_p12 = scmp.lt.s32.totalorder %s71_s18, %s71_s18 }
  0x1e   :  { %p1039_p13 = scmp.lt.s32.totalorder %s1037_s22, %s1033_s4 }
  0x20   :  { %p1040_p0 = por %p1039_p13, %p1038_p12 }
  0x22   :  { %p1041_p1 = pnand %p1040_p0, %p1034_p11 }
  0x24   :  { %1044 = shalt.err (!%p1041_p1)
}
  0x25   :  { %73 = dma.hbm_to_vmem [thread:$0]  %s1385_s7, 16, %s71_s18, [#allocation8]  }
  0x26   :  { %s1045_s17 = scalar_lea.hbm %s1381_s3, 16 }
  0x27   :  { %p1046_p2 = scmp.ne.s32.totalorder %s1381_s3, %s1045_s17  ;;  %p1049_p3 = scmp.lt.u32.totalorder %s1045_s17, %s1381_s3 }
  0x29   :  { %p1051_p4 = pnand %p1049_p3, %p1046_p2 }
  0x2b   :  { %1054 = shalt.err (!%p1051_p4)
}
  0x2c   :  { %s1055_s25 = scalar_lea.vmem %s35_s20, 16  ;;  %s1059_s26 = scalar_lea.vmem %s35_s20, 32 }
  0x2d   :  { %p1056_p5 = scmp.ne.s32.totalorder %s35_s20, %s1055_s25  ;;  %p1060_p6 = scmp.lt.s32.totalorder %s35_s20, %s35_s20 }
  0x2e   :  { %p1061_p7 = scmp.lt.s32.totalorder %s1059_s26, %s1055_s25 }
  0x30   :  { %p1062_p8 = por %p1061_p7, %p1060_p6 }
  0x32   :  { %p1063_p9 = pnand %p1062_p8, %p1056_p5 }
  0x34   :  { %1066 = shalt.err (!%p1063_p9)
}
  0x35   :  { %37 = dma.hbm_to_vmem [thread:$0]  %s1381_s3, 16, %s35_s20, [#allocation3]  }
  0x36   :  { %s1146_s27 = smov [#allocation6]   ;;  %s1067_s29 = scalar_lea.hbm %s1384_s6, 1024 }
  0x37   :  { %s57_s28 = sshll.u32 %s1146_s27, 4  ;;  %p1068_p10 = scmp.ne.s32.totalorder %s1384_s6, %s1067_s29  ;;  %s58_s28 = int_to_ptr.vmem [resolvable:$true] %s57_s28 }
  0x38   :  { %p1071_p11 = scmp.lt.u32.totalorder %s1067_s29, %s1384_s6 }
  0x3a   :  { %p1073_p12 = pnand %p1071_p11, %p1068_p10 }
  0x3c   :  { %1076 = shalt.err (!%p1073_p12)
}
  0x3d   :  { %s1077_s19 = scalar_lea.vmem %s58_s28, 1024  ;;  %p1082_p0 = scmp.lt.s32.totalorder %s58_s28, %s58_s28 }
  0x3e   :  { %p1078_p13 = scmp.ne.s32.totalorder %s58_s28, %s1077_s19  ;;  %p1083_p1 = scmp.lt.s32.totalorder %s1077_s19, %s1077_s19 }
  0x40   :  { %p1084_p2 = por %p1083_p1, %p1082_p0 }
  0x42   :  { %p1085_p3 = pnand %p1084_p2, %p1078_p13 }
  0x44   :  { %1088 = shalt.err (!%p1085_p3)
}
  0x45   :  { %s1147_s3 = smov 64   ;;  %s1148_s20 = smov 4  }
  0x46   :  { %63 = dma.hbm_to_vmem [thread:$0]  %s1384_s6, 1024, %s58_s28, [#allocation5], %s1147_s3, %s1147_s3, %s1148_s20  }
  0x47   :  { %s1149_s24 = smov [#allocation9]   ;;  %s1150_s26 = smov [#allocation10]  }
  0x48   :  { %s79_s25 = sshll.u32 %s1149_s24, 4  ;;  %s92_s7 = sshll.u32 %s1150_s26, 4  ;;  %s80_s25 = int_to_ptr.vmem [resolvable:$true] %s79_s25  ;;  %s93_s7 = int_to_ptr.vmem [resolvable:$true] %s92_s7 }
  0x49   :  { %s1089_s4 = scalar_lea.hbm %s1386_s8, 2048 }
  0x4a   :  { %p1090_p4 = scmp.ne.s32.totalorder %s1386_s8, %s1089_s4  ;;  %p1093_p5 = scmp.lt.u32.totalorder %s1089_s4, %s1386_s8 }
  0x4c   :  { %p1095_p6 = pnand %p1093_p5, %p1090_p4 }
  0x4e   :  { %1098 = shalt.err (!%p1095_p6)
}
  0x4f   :  { %s1099_s6 = scalar_lea.vmem %s80_s25, 2048  ;;  %p1104_p8 = scmp.lt.s32.totalorder %s80_s25, %s80_s25 }
  0x50   :  { %p1100_p7 = scmp.ne.s32.totalorder %s80_s25, %s1099_s6  ;;  %p1105_p9 = scmp.lt.s32.totalorder %s1099_s6, %s1099_s6 }
  0x52   :  { %p1106_p10 = por %p1105_p9, %p1104_p8 }
  0x54   :  { %p1107_p11 = pnand %p1106_p10, %p1100_p7 }
  0x56   :  { %1110 = shalt.err (!%p1107_p11)
}
  0x57   :  { %85 = dma.hbm_to_vmem [thread:$0]  %s1386_s8, 2048, %s80_s25, [#allocation8], %s1142_s13, %s1142_s13, %s1143_s14  }
  0x58   :  { %s1111_s3 = scalar_lea.hbm %s1387_s9, 32 }
  0x59   :  { %p1112_p12 = scmp.ne.s32.totalorder %s1387_s9, %s1111_s3  ;;  %p1115_p13 = scmp.lt.u32.totalorder %s1111_s3, %s1387_s9 }
  0x5b   :  { %p1117_p0 = pnand %p1115_p13, %p1112_p12 }
  0x5d   :  { %1120 = shalt.err (!%p1117_p0)
}
  0x5e   :  { %s1121_s26 = scalar_lea.vmem %s93_s7, 32  ;;  %p1126_p2 = scmp.lt.s32.totalorder %s93_s7, %s93_s7 }
  0x5f   :  { %p1122_p1 = scmp.ne.s32.totalorder %s93_s7, %s1121_s26  ;;  %p1127_p3 = scmp.lt.s32.totalorder %s1121_s26, %s1121_s26 }
  0x61   :  { %p1128_p4 = por %p1127_p3, %p1126_p2 }
  0x63   :  { %p1129_p5 = pnand %p1128_p4, %p1122_p1 }
  0x65   :  { %1132 = shalt.err (!%p1129_p5)
}
  0x66   :  { %95 = dma.hbm_to_vmem [thread:$0]  %s1387_s9, 32, %s93_s7, [#allocation11]  }
  0x67   :  { %1133 = dma.done.wait [#allocation3], 16  }
  0x68   :  { %1134 = vsyncadd [#allocation3], 4294967280 }
  0x69   :  { %1135 = dma.done.wait [#allocation5], 3072  }
  0x6a   :  { %1136 = vsyncadd [#allocation5], 4294964224 }
  0x6b   :  { %1137 = dma.done.wait [#allocation8], 2064  }
  0x6c   :  { %1138 = vsyncadd [#allocation8], 4294965232 }
  0x6d   :  { %1139 = dma.done.wait [#allocation11], 32  }
  0x6e   :  { %1140 = vsyncadd [#allocation11], 4294967264  ;;  %v914_v0 = vld [vmem:[%s1380_s2 + $0x40] sm:$0xff]   ;;  %v916_v2 = vld [vmem:[%s1380_s2 + $0x48] sm:$0xff]   ;;  %v1151_v34 = vmov 0   ;;  %v1152_v36 = vmov 0.0  }
  0x6f   :  { %v915_v1 = vld [vmem:[%s1380_s2] sm:$0xff]   ;;  %850 = vmatprep.subr.bf16.mxu0 %v914_v0  ;;  %v917_v3 = vld [vmem:[%s1380_s2 + $0x8] sm:$0xff]   ;;  %v918_v4 = vld [vmem:[%s1380_s2 + $0x50] sm:$0xff]   ;;  %446 = vmatprep.mubr.bf16.mxu1 %v1151_v34  ;;  %vm1153_vm0 = vmmov 0  }
  0x70   :  { %851 = vmatpush3.bf16.msra.mxu0 %v915_v1  ;;  %v919_v5 = vld [vmem:[%s1380_s2 + $0x10] sm:$0xff]   ;;  %v920_v6 = vld [vmem:[%s1380_s2 + $0x58] sm:$0xff]   ;;  %v922_v8 = vld [vmem:[%s1380_s2 + $0x60] sm:$0xff]  }
  0x71   :  { %852 = vmatprep.subr.bf16.mxu0 %v916_v2  ;;  %v921_v7 = vld [vmem:[%s1380_s2 + $0x18] sm:$0xff]   ;;  %v923_v9 = vld [vmem:[%s1380_s2 + $0x20] sm:$0xff]   ;;  %v924_v10 = vld [vmem:[%s1380_s2 + $0x68] sm:$0xff]  }
  0x72   :  { %v932_v11 = vld [vmem:[%s1378_s0 + $0x4] ss:$8 sps:$4 sm:$0xff]   ;;  %v936_v15 = vld [vmem:[#allocation4 + $0x14] ss:$8 sps:$4 sm:$0xff]   ;;  %v938_v17 = vld [vmem:[#allocation4 + $0x10] ss:$8 sps:$4 sm:$0xff]  }
  0x73   :  { %v933_v12 = vld [vmem:[#allocation4 + $0x4] ss:$8 sps:$4 sm:$0xff]   ;;  %v935_v13 = vld [vmem:[#allocation4] ss:$8 sps:$4 sm:$0xff]   ;;  %294 = vmatprep.mubr.bf16.mxu0 %v932_v11  ;;  %v928_v20 = vld [vmem:[%s1380_s2 + $0x78] sm:$0xff]  }
  0x74   :  { %853 = vmatpush3.bf16.msra.mxu0 %v917_v3  ;;  %v925_v14 = vld [vmem:[%s1380_s2 + $0x28] sm:$0xff]   ;;  %v926_v16 = vld [vmem:[%s1380_s2 + $0x70] sm:$0xff]   ;;  %414 = vmatprep.subr.bf16.mxu1 %v933_v12  ;;  %v929_v23 = vld [vmem:[%s1380_s2 + $0x38] sm:$0xff]  }
  0x75   :  { %854 = vmatprep.subr.bf16.mxu0 %v918_v4  ;;  %415 = vmatpush1.bf16.msra.mxu1 %v935_v13  ;;  %v927_v18 = vld [vmem:[%s1380_s2 + $0x30] sm:$0xff]   ;;  %v941_v21 = vld [vmem:[#allocation4 + $0x20] ss:$8 sps:$4 sm:$0xff]   ;;  %v786_v38 = vld [vmem:[#allocation2] ss:$0 sm:$0xff]  ;;  %v324_v4 = vlaneseq }
  0x76   :  { %416 = vmatprep.subr.bf16.mxu1 %v936_v15  ;;  %v939_v19 = vld [vmem:[#allocation4 + $0x24] ss:$8 sps:$4 sm:$0xff]   ;;  %v942_v22 = vld [vmem:[#allocation4 + $0x34] ss:$8 sps:$4 sm:$0xff]   ;;  %v944_v24 = vld [vmem:[#allocation4 + $0x30] ss:$8 sps:$4 sm:$0xff]  }
  0x77   :  { %v930_v25 = vld [vmem:[%s1378_s0] ss:$8 sps:$4 sm:$0xff]   ;;  %v950_v29 = vld [vmem:[#allocation4 + $0x50] ss:$8 sps:$4 sm:$0xff]   ;;  %v965_v56 = vld [vmem:[#allocation9] ss:$8 sps:$4 sm:$0xff]  }
  0x78   :  { %855 = vmatpush3.bf16.msra.mxu0 %v919_v5  ;;  %v945_v26 = vld [vmem:[#allocation4 + $0x44] ss:$8 sps:$4 sm:$0xff]   ;;  %v947_v27 = vld [vmem:[#allocation4 + $0x40] ss:$8 sps:$4 sm:$0xff]   ;;  %v948_v28 = vld [vmem:[#allocation4 + $0x54] ss:$8 sps:$4 sm:$0xff]  }
  0x79   :  { %856 = vmatprep.subr.bf16.mxu0 %v920_v6  ;;  %417 = vmatpush1.bf16.msra.mxu1 %v938_v17  ;;  %v951_v30 = vld [vmem:[#allocation4 + $0x64] ss:$8 sps:$4 sm:$0xff]   ;;  %v953_v31 = vld [vmem:[#allocation4 + $0x60] ss:$8 sps:$4 sm:$0xff]   ;;  %v954_v32 = vld [vmem:[#allocation4 + $0x74] ss:$8 sps:$4 sm:$0xff]  }
  0x7a   :  { %418 = vmatprep.subr.bf16.mxu1 %v939_v19  ;;  %v956_v33 = vld [vmem:[#allocation4 + $0x70] ss:$8 sps:$4 sm:$0xff]   ;;  %v957_v35 = vld [vmem:[#allocation6] sm:$0xff]   ;;  %v958_v49 = vld [vmem:[#allocation6 + $0x8] sm:$0xff]   ;;  %v325_v5 = vshrl.u32 %v324_v4, 7 }
  0x7b   :  { %v959_v50 = vld [vmem:[#allocation6 + $0x10] sm:$0xff]   ;;  %v960_v51 = vld [vmem:[#allocation6 + $0x18] sm:$0xff]   ;;  %v961_v52 = vld [vmem:[#allocation6 + $0x20] sm:$0xff]  }
  0x7c   :  { %857 = vmatpush3.bf16.msra.mxu0 %v921_v7  ;;  %v962_v53 = vld [vmem:[#allocation6 + $0x28] sm:$0xff]   ;;  %v963_v54 = vld [vmem:[#allocation6 + $0x30] sm:$0xff]   ;;  %v964_v55 = vld [vmem:[#allocation6 + $0x38] sm:$0xff]   ;;  %v326_v6 = vsub.s32 0, %v325_v5 }
  0x7d   :  { %858 = vmatprep.subr.bf16.mxu0 %v922_v8  ;;  %419 = vmatpush1.bf16.msra.mxu1 %v941_v21  ;;  %v967_v57 = vld [vmem:[#allocation9 + $0x4] ss:$8 sps:$4 sm:$0xff]   ;;  %v970_v58 = vld [vmem:[#allocation9 + $0x14] ss:$8 sps:$4 sm:$0xff]   ;;  %v968_v59 = vld [vmem:[#allocation9 + $0x10] ss:$8 sps:$4 sm:$0xff]  }
  0x7e   :  { %420 = vmatprep.subr.bf16.mxu1 %v942_v22  ;;  %v973_v60 = vld [vmem:[#allocation9 + $0x24] ss:$8 sps:$4 sm:$0xff]   ;;  %v971_v61 = vld [vmem:[#allocation9 + $0x20] ss:$8 sps:$4 sm:$0xff]   ;;  %v976_v62 = vld [vmem:[#allocation9 + $0x34] ss:$8 sps:$4 sm:$0xff]  }
  0x7f   :  { %v974_v63 = vld [vmem:[#allocation9 + $0x30] ss:$8 sps:$4 sm:$0xff]   ;;  %v979_v0 = vld [vmem:[#allocation9 + $0x44] ss:$8 sps:$4 sm:$0xff]   ;;  %v977_v1 = vld [vmem:[#allocation9 + $0x40] ss:$8 sps:$4 sm:$0xff]  }
  0x80   :  { %859 = vmatpush3.bf16.msra.mxu0 %v923_v9  ;;  %v982_v2 = vld [vmem:[#allocation9 + $0x54] ss:$8 sps:$4 sm:$0xff]   ;;  %v980_v3 = vld [vmem:[#allocation9 + $0x50] ss:$8 sps:$4 sm:$0xff]   ;;  %v330_v8 = vsub.s32 1, %v325_v5 }
  0x81   :  { %860 = vmatprep.subr.bf16.mxu0 %v924_v10  ;;  %421 = vmatpush1.bf16.msra.mxu1 %v944_v24  ;;  %v322_v7 = vld [vmem:[%s1383_s5] sm:$0x3] }
  0x82   :  { %422 = vmatprep.subr.bf16.mxu1 %v945_v26  ;;  %v327_v9 = vrot.slane %v322_v7, %v326_v6  ;;  %v331_v10 = vrot.slane %v322_v7, %v330_v8 }
  0x84   :  { %861 = vmatpush3.bf16.msra.mxu0 %v925_v14 }
  0x85   :  { %862 = vmatprep.subr.bf16.mxu0 %v926_v16  ;;  %423 = vmatpush1.bf16.msra.mxu1 %v947_v27 }
  0x86   :  { %424 = vmatprep.subr.bf16.mxu1 %v948_v28 }
  0x88   :  { %863 = vmatpush3.bf16.msra.mxu0 %v927_v18 }
  0x89   :  { %864 = vmatprep.subr.bf16.mxu0 %v928_v20  ;;  %425 = vmatpush1.bf16.msra.mxu1 %v950_v29 }
  0x8a   :  { %426 = vmatprep.subr.bf16.mxu1 %v951_v30 }
  0x8c   :  { %865 = vmatpush3.bf16.msra.mxu0 %v929_v23  ;;  %v461_v23 = vld [vmem:[%s1379_s1] sm:$0xff] }
  0x8d   :  { %427 = vmatpush1.bf16.msra.mxu1 %v953_v31  ;;  %881 = vmatprep.subr.bf16.mxu0 %v1152_v36 }
  0x8e   :  { %428 = vmatprep.subr.bf16.mxu1 %v954_v32  ;;  %v985_v32 = vld [vmem:[#allocation9 + $0x64] ss:$8 sps:$4 sm:$0xff]  }
  0x8f   :  { %295 = vmatmul.mubr.bf16.vlgmr.msra.gmra.mrb[0].mxu0 %v930_v25  ;;  %v462_v25 = vld [vmem:[%s1379_s1 + $0x8] sm:$0xff] }
  0x90   :  { %882 = vmatpush3.bf16.msra.mxu0 %v957_v35  ;;  %897 = vmatprep.mubr.msk.bf16.mxu0 %vm1153_vm0, %v1152_v36  ;;  %v986_v35 = vld [vmem:[#allocation9 + $0x70] ss:$8 sps:$4 sm:$0xff]  }
  0x91   :  { %429 = vmatpush1.bf16.msra.mxu1 %v956_v33  ;;  %883 = vmatprep.subr.bf16.mxu0 %v1152_v36  ;;  %v983_v33 = vld [vmem:[#allocation9 + $0x60] ss:$8 sps:$4 sm:$0xff]  }
  0x92   :  { %697 = vmatprep.subr.bf16.mxu1 %v967_v57 }
  0x94   :  { %884 = vmatpush3.bf16.msra.mxu0 %v958_v49 }
  0x95   :  { %885 = vmatprep.subr.bf16.mxu0 %v1152_v36 }
  0x98   :  { %886 = vmatpush3.bf16.msra.mxu0 %v959_v50 }
  0x99   :  { %887 = vmatprep.subr.bf16.mxu0 %v1152_v36 }
  0x9c   :  { %888 = vmatpush3.bf16.msra.mxu0 %v960_v51 }
  0x9d   :  { %889 = vmatprep.subr.bf16.mxu0 %v1152_v36 }
  0xa0   :  { %890 = vmatpush3.bf16.msra.mxu0 %v961_v52 }
  0xa1   :  { %891 = vmatprep.subr.bf16.mxu0 %v1152_v36 }
  0xa4   :  { %892 = vmatpush3.bf16.msra.mxu0 %v962_v53 }
  0xa5   :  { %893 = vmatprep.subr.bf16.mxu0 %v1152_v36 }
  0xa8   :  { %894 = vmatpush3.bf16.msra.mxu0 %v963_v54 }
  0xa9   :  { %895 = vmatprep.subr.bf16.mxu0 %v1152_v36  ;;  %v821_v36 = vld [vmem:[#allocation7] ss:$0 sm:$0xff] }
  0xac   :  { %896 = vmatpush3.bf16.msra.mxu0 %v964_v55 }
 0x162   :  { %v866_v37 = vpop.f32.mrb[0].mxu0 }
 0x163   :  { %v867_v39 = vpop.f32.mrb[1].mxu0 }
 0x164   :  { %v868_v40 = vadd.f32 %v867_v39, %v866_v37  ;;  %v869_v41 = vpop.f32.mrb[2].mxu0 }
 0x165   :  { %v870_v42 = vpop.f32.mrb[3].mxu0 }
 0x166   :  { %v297_v43 = vadd.f32 %v868_v40, %v786_v38  ;;  %v871_v44 = vadd.f32 %v870_v42, %v869_v41 }
 0x168   :  { %v300_v45 = vadd.f32 %v871_v44, %v786_v38  ;;  %v303_v46 = vmax.f32 %v297_v43, 0.0 }
 0x16a   :  { %v304_v47 = vmax.f32 %v300_v45, 0.0 }
 0x16c   :  { %v305_v48 = vpack.c.bf16 %v304_v47, %v303_v46  ;;  %v605_v46 = vld [vmem:[#allocation10] sm:$0x3] }
 0x16d   :  { %v610_v47 = vrot.slane %v605_v46, %v326_v6 }
 0x16e   :  { %447 = vmatmul.mubr.bf16.vlgmr.msra.gmra.mrb[0].mxu1 %v305_v48  ;;  %v614_v48 = vrot.slane %v605_v46, %v330_v8 }
 0x16f   :  { %729 = vmatprep.mubr.bf16.mxu1 %v1151_v34  ;;  %698 = vmatpush1.bf16.msra.mxu1 %v965_v56  ;;  %v988_v34 = vld [vmem:[#allocation9 + $0x74] ss:$8 sps:$4 sm:$0xff]  }
 0x170   :  { %699 = vmatprep.subr.bf16.mxu1 %v970_v58 }
 0x173   :  { %700 = vmatpush1.bf16.msra.mxu1 %v968_v59 }
 0x174   :  { %701 = vmatprep.subr.bf16.mxu1 %v973_v60 }
 0x177   :  { %702 = vmatpush1.bf16.msra.mxu1 %v971_v61 }
 0x178   :  { %703 = vmatprep.subr.bf16.mxu1 %v976_v62 }
 0x17b   :  { %704 = vmatpush1.bf16.msra.mxu1 %v974_v63 }
 0x17c   :  { %705 = vmatprep.subr.bf16.mxu1 %v979_v0 }
 0x17f   :  { %706 = vmatpush1.bf16.msra.mxu1 %v977_v1 }
 0x180   :  { %707 = vmatprep.subr.bf16.mxu1 %v982_v2 }
 0x183   :  { %708 = vmatpush1.bf16.msra.mxu1 %v980_v3 }
 0x184   :  { %709 = vmatprep.subr.bf16.mxu1 %v985_v32 }
 0x187   :  { %710 = vmatpush1.bf16.msra.mxu1 %v983_v33 }
 0x188   :  { %711 = vmatprep.subr.bf16.mxu1 %v988_v34 }
 0x18b   :  { %712 = vmatpush1.bf16.msra.mxu1 %v986_v35 }
 0x241   :  { %v448_v11 = vpop.f32.mrb[0].mxu1 }
 0x242   :  { %v449_v12 = vadd.f32 %v448_v11, %v327_v9  ;;  %v450_v13 = vpop.f32.mrb[1].mxu1 }
 0x243   :  { %v451_v14 = vadd.f32 %v450_v13, %v331_v10  ;;  %v452_v15 = vpop.f32.mrb[2].mxu1 }
 0x244   :  { %457 = vst [vmem:[%s1388_s10] sm:$0xff] %v449_v12  ;;  %v453_v16 = vadd.f32 %v452_v15, %v327_v9  ;;  %v454_v17 = vpop.f32.mrb[3].mxu1 }
 0x245   :  { %459 = vst [vmem:[%s1389_s11] sm:$0xff] %v451_v14  ;;  %v463_v18 = vmul.f32 0.5, %v451_v14  ;;  %v455_v19 = vadd.f32 %v454_v17, %v331_v10 }
 0x246   :  { %458 = vst [vmem:[%s1388_s10 + $0x8] sm:$0xff] %v453_v16 }
 0x247   :  { %v465_v20 = vmul.f32 1.442695, %v463_v18  ;;  %460 = vst [vmem:[%s1389_s11 + $0x8] sm:$0xff] %v455_v19  ;;  %v464_v21 = vmul.f32 0.5, %v455_v19 }
 0x249   :  { %989 = vpow2.f32 %v465_v20  ;;  %v467_v22 = vmul.f32 1.442695, %v464_v21 }
 0x24b   :  { %991 = vpow2.f32 %v467_v22 }
 0x253   :  { %v990_v24 = vpop.eup %989 }
 0x254   :  { %v469_v26 = vmul.f32 %v990_v24, %v461_v23 }
 0x255   :  { %v992_v27 = vpop.eup %991 }
 0x256   :  { %v470_v28 = vmul.f32 %v992_v27, %v462_v25  ;;  %v471_v29 = vadd.f32 %v469_v26, %v449_v12 }
 0x258   :  { %v472_v30 = vadd.f32 %v470_v28, %v453_v16 }
 0x25a   :  { %v473_v31 = vpack.c.bf16 %v472_v30, %v471_v29 }
 0x25c   :  { %898 = vmatmul.mubr.bf16.vlgmr.msra.gmra.mrb[4].mxu0 %v473_v31 }
 0x32f   :  { %v579_v37 = vpop.f32.mrb[4].mxu0 }
 0x330   :  { %v580_v38 = vadd.f32 %v821_v36, %v579_v37  ;;  %v899_v39 = vpop.f32.mrb[5].mxu0 }
 0x331   :  { %v582_v40 = vpop.f32.mrb[6].mxu0 }
 0x332   :  { %v583_v41 = vadd.f32 %v821_v36, %v582_v40  ;;  %v900_v42 = vpop.f32.mrb[7].mxu0  ;;  %v586_v43 = vmax.f32 %v580_v38, 0.0 }
 0x334   :  { %v587_v44 = vmax.f32 %v583_v41, 0.0 }
 0x336   :  { %v588_v45 = vpack.c.bf16 %v587_v44, %v586_v43 }
 0x338   :  { %730 = vmatmul.mubr.bf16.vlgmr.msra.gmra.mrb[4].mxu1 %v588_v45 }
 0x40b   :  { %v731_v49 = vpop.f32.mrb[4].mxu1 }
 0x40c   :  { %v732_v50 = vadd.f32 %v731_v49, %v610_v47  ;;  %v733_v51 = vpop.f32.mrb[5].mxu1 }
 0x40d   :  { %v734_v52 = vadd.f32 %v733_v51, %v614_v48  ;;  %v735_v53 = vpop.f32.mrb[6].mxu1 }
 0x40e   :  { %v740_v54 = vmul.f32 0.5, %v732_v50  ;;  %v736_v55 = vadd.f32 %v735_v53, %v610_v47  ;;  %v737_v56 = vpop.f32.mrb[7].mxu1 }
 0x40f   :  { %v741_v57 = vmul.f32 0.5, %v734_v52  ;;  %v738_v58 = vadd.f32 %v737_v56, %v614_v48 }
 0x410   :  { %993 = vtanh.f32 %v740_v54  ;;  %v742_v59 = vmul.f32 0.5, %v736_v55 }
 0x411   :  { %995 = vtanh.f32 %v741_v57  ;;  %v743_v60 = vmul.f32 0.5, %v738_v58 }
 0x412   :  { %997 = vtanh.f32 %v742_v59 }
 0x413   :  { %999 = vtanh.f32 %v743_v60 }
 0x41a   :  { %v994_v61 = vpop.eup %993 }
 0x41b   :  { %v996_v62 = vpop.eup %995  ;;  %v748_v63 = vmul.f32 0.5, %v994_v61 }
 0x41c   :  { %v998_v0 = vpop.eup %997  ;;  %v749_v1 = vmul.f32 0.5, %v996_v62 }
 0x41d   :  { %v1000_v2 = vpop.eup %999  ;;  %v752_v3 = vadd.f32 0.5, %v748_v63  ;;  %v750_v4 = vmul.f32 0.5, %v998_v0 }
 0x41e   :  { %v753_v5 = vadd.f32 0.5, %v749_v1  ;;  %v751_v6 = vmul.f32 0.5, %v1000_v2 }
 0x41f   :  { %v754_v7 = vadd.f32 0.5, %v750_v4 }
 0x420   :  { %v848_v8 = vpack.c.bf16 %v753_v5, %v752_v3  ;;  %v755_v9 = vadd.f32 0.5, %v751_v6 }
 0x422   :  { %768 = vst [vmem:[%s1390_s12] sm:$0xff] %v848_v8  ;;  %v849_v10 = vpack.c.bf16 %v755_v9, %v754_v7 }
 0x424   :  { %769 = vst [vmem:[%s1390_s12 + $0x8] sm:$0xff] %v849_v10 }
 0x425   :  { %782 = vsyncpa [#allocation3], 1 }
 0x426   :  { %783 = vsyncpa [#allocation5], 1 }
 0x427   :  { %784 = vsyncpa [#allocation8], 1 }
 0x428   :  { %785 = vsyncpa [#allocation11], 1 }

</bundles_post_ra>
